<compile_context>
chip_gen: v7x
topology: tpu7x:2x2x1
jax: 0.10.0
libtpu: 0.0.40
codegen_flags: <defaults>
</compile_context>

<pallas_src>
import jax
import jax.numpy as jnp
from jax.experimental import pallas as pl
from jax.experimental.pallas import tpu as pltpu

# ---------------- model hyper-parameters (small, deterministic) ----------------
B = 2           # batch
N = 8           # sequence length
D = 32          # model dimension
H = 2           # multi_head
HD = D // H     # head dim
SCALE = float(HD) ** -0.5
EPS = 1e-5      # nn.LayerNorm default eps
BN = B * N


def _transformer_block_kernel(x_ref, g_ref, b_ref, wqkv_ref, wo_ref, o_ref):
    x = x_ref[...].astype(jnp.float32)                                  # (B*N, D)

    # Hoisted broadcasts, reused by BOTH LayerNorm applications (JAX does not CSE them).
    gamma = jnp.broadcast_to(g_ref[...].astype(jnp.float32), (BN, D))   # (B*N, D)
    beta = jnp.broadcast_to(b_ref[...].astype(jnp.float32), (BN, D))    # (B*N, D)

    def layer_norm(v):
        mu = jnp.mean(v, axis=-1, keepdims=True)
        d = v - mu
        var = jnp.mean(d * d, axis=-1, keepdims=True)
        return d * jax.lax.rsqrt(var + EPS) * gamma + beta

    # ---- pre-LN ----
    h = layer_norm(x)                                                   # (B*N, D)

    # ---- qkv projection for all batch rows at once (one MXU weight push) ----
    qkv = jnp.dot(h, wqkv_ref[...], preferred_element_type=jnp.float32)  # (B*N, 3D)
    w_o = wo_ref[...].astype(jnp.float32)                               # (D, D)

    # Contract last dims of q and k directly (q @ k^T without materializing a transpose).
    dn = (((1,), (1,)), ((), ()))

    per_batch = []
    for bb in range(B):            # B and H are tiny & static: unrolled at trace time
        r0 = bb * N                # sublane-aligned static row offset (multiple of 8)
        acc = jnp.zeros((N, D), jnp.float32)
        for hh in range(H):
            c = hh * HD            # static, 16-lane-aligned column offset within each group
            q = qkv[r0:r0 + N, c:c + HD]                                # (N, HD)
            k = qkv[r0:r0 + N, D + c:D + c + HD]                        # (N, HD)
            v = qkv[r0:r0 + N, 2 * D + c:2 * D + c + HD]                # (N, HD)

            s = jax.lax.dot_general(q, k, dn,
                                    preferred_element_type=jnp.float32) * SCALE  # (N, N)
            s = s - jnp.max(s, axis=-1, keepdims=True)
            p = jnp.exp(s)
            p = p * pl.reciprocal(jnp.sum(p, axis=-1, keepdims=True), approx=True)

            o_h = jnp.dot(p, v, preferred_element_type=jnp.float32)     # (N, HD)
            # Project through the matching row block of W_o and accumulate over heads:
            # sum_h (o_h @ W_o[h*HD:(h+1)*HD, :]) == concat(heads) @ W_o, no lane concat.
            acc = acc + jnp.dot(o_h, w_o[c:c + HD, :],
                                preferred_element_type=jnp.float32)     # (N, D)
        per_batch.append(acc)

    # Row-axis (sublane) concat at 8-row boundaries: vreg placement only, no lane shuffles.
    attn = jnp.concatenate(per_batch, axis=0)                           # (B*N, D)

    # ---- residual + second application of the SAME LayerNorm ----
    y = x + attn
    o_ref[...] = layer_norm(y).astype(o_ref.dtype)


def transformer_block(x, gamma, beta, w_qkv, w_o):
    """x: (B, N, D) float32.  Returns (B, N, D) float32."""
    Bn, Nn, Dn = x.shape
    x2d = x.reshape(Bn * Nn, Dn)   # free metadata reshape in the XLA wrapper

    out2d = pl.pallas_call(
        _transformer_block_kernel,
        out_shape=jax.ShapeDtypeStruct((Bn * Nn, Dn), x.dtype),
        # No grid: single program, every operand fully VMEM-resident, DMA'd exactly once.
        in_specs=[pl.BlockSpec(memory_space=pltpu.MemorySpace.VMEM)] * 5,
        out_specs=pl.BlockSpec(memory_space=pltpu.MemorySpace.VMEM),
    )(x2d, gamma, beta, w_qkv, w_o)

    return out2d.reshape(Bn, Nn, Dn)


# ---------------- pure-JAX reference for correctness check ----------------
def _reference(x, gamma, beta, w_qkv, w_o):
    def ln(v):
        mu = jnp.mean(v, axis=-1, keepdims=True)
        var = jnp.mean((v - mu) ** 2, axis=-1, keepdims=True)
        return (v - mu) / jnp.sqrt(var + EPS) * gamma[0] + beta[0]

    h = ln(x)                                                         # (B, N, D)
    qkv = jnp.einsum("bnd,de->bne", h, w_qkv)                         # (B, N, 3D)
    q = qkv[..., :D].reshape(B, N, H, HD).transpose(0, 2, 1, 3)
    k = qkv[..., D:2 * D].reshape(B, N, H, HD).transpose(0, 2, 1, 3)
    v = qkv[..., 2 * D:].reshape(B, N, H, HD).transpose(0, 2, 1, 3)
    s = jnp.einsum("bhnd,bhmd->bhnm", q, k) * SCALE
    p = jax.nn.softmax(s, axis=-1)
    a = jnp.einsum("bhnm,bhmd->bhnd", p, v).transpose(0, 2, 1, 3).reshape(B, N, D)
    a = jnp.einsum("bnd,de->bne", a, w_o)
    return ln(x + a)


if __name__ == "__main__":
    key = jax.random.PRNGKey(0)
    kx, kq, ko = jax.random.split(key, 3)

    x = jax.random.normal(kx, (B, N, D), dtype=jnp.float32)

    # Deterministic parameter init (Linear weights ~ small normal; LayerNorm: ones/zeros,
    # matching PyTorch default affine init).  bias=False for both linears.
    w_qkv = jax.random.normal(kq, (D, 3 * D), dtype=jnp.float32) * 0.02
    w_o = jax.random.normal(ko, (D, D), dtype=jnp.float32) * 0.02
    gamma = jnp.ones((1, D), dtype=jnp.float32)
    beta = jnp.zeros((1, D), dtype=jnp.float32)

    out = transformer_block(x, gamma, beta, w_qkv, w_o)
    out = jax.block_until_ready(out)

    ref = _reference(x, gamma, beta, w_qkv, w_o)
    assert out.shape == (B, N, D)
    assert jnp.allclose(out, ref, atol=1e-4, rtol=1e-4), "mismatch vs reference"

    print("KERNEL_OK")
</pallas_src>

<mosaic_0001>
module attributes {stable_mosaic.version = 11 : i64} {
  func.func @_transformer_block_kernel(%arg0: memref<16x32xf32, #tpu.memory_space<vmem>>, %arg1: memref<1x32xf32, #tpu.memory_space<vmem>>, %arg2: memref<1x32xf32, #tpu.memory_space<vmem>>, %arg3: memref<32x96xf32, #tpu.memory_space<vmem>>, %arg4: memref<32x32xf32, #tpu.memory_space<vmem>>, %arg5: memref<16x32xf32, #tpu.memory_space<vmem>>) attributes {dimension_semantics = [], scalar_prefetch = 0 : i64, scratch_operands = 0 : i64, tpu.core_type = #tpu.core_type<tc>} {
    %c0 = arith.constant 0 : index
    %c0_0 = arith.constant 0 : index
    %0 = vector.load %arg0[%c0, %c0_0] : memref<16x32xf32, #tpu.memory_space<vmem>>, vector<16x32xf32>
    %c0_1 = arith.constant 0 : index
    %c0_2 = arith.constant 0 : index
    %1 = vector.load %arg1[%c0_1, %c0_2] : memref<1x32xf32, #tpu.memory_space<vmem>>, vector<1x32xf32>
    %2 = vector.shape_cast %1 : vector<1x32xf32> to vector<1x32xf32>
    %3 = vector.broadcast %2 : vector<1x32xf32> to vector<16x32xf32>
    %c0_3 = arith.constant 0 : index
    %c0_4 = arith.constant 0 : index
    %4 = vector.load %arg2[%c0_3, %c0_4] : memref<1x32xf32, #tpu.memory_space<vmem>>, vector<1x32xf32>
    %5 = vector.shape_cast %4 : vector<1x32xf32> to vector<1x32xf32>
    %6 = vector.broadcast %5 : vector<1x32xf32> to vector<16x32xf32>
    %cst = arith.constant dense<0.000000e+00> : vector<16xf32>
    %7 = vector.multi_reduction <add>, %0, %cst [1] : vector<16x32xf32> to vector<16xf32>
    %8 = vector.shape_cast %7 : vector<16xf32> to vector<16x1xf32>
    %cst_5 = arith.constant 3.200000e+01 : f32
    %9 = vector.broadcast %cst_5 : f32 to vector<16x1xf32>
    %10 = arith.divf %8, %9 : vector<16x1xf32>
    %11 = vector.broadcast %10 : vector<16x1xf32> to vector<16x32xf32>
    %12 = arith.subf %0, %11 : vector<16x32xf32>
    %13 = arith.mulf %12, %12 : vector<16x32xf32>
    %cst_6 = arith.constant dense<0.000000e+00> : vector<16xf32>
    %14 = vector.multi_reduction <add>, %13, %cst_6 [1] : vector<16x32xf32> to vector<16xf32>
    %15 = vector.shape_cast %14 : vector<16xf32> to vector<16x1xf32>
    %cst_7 = arith.constant 3.200000e+01 : f32
    %16 = vector.broadcast %cst_7 : f32 to vector<16x1xf32>
    %17 = arith.divf %15, %16 : vector<16x1xf32>
    %cst_8 = arith.constant 9.99999974E-6 : f32
    %18 = vector.broadcast %cst_8 : f32 to vector<16x1xf32>
    %19 = arith.addf %17, %18 : vector<16x1xf32>
    %20 = math.rsqrt %19 : vector<16x1xf32>
    %21 = vector.broadcast %20 : vector<16x1xf32> to vector<16x32xf32>
    %22 = arith.mulf %12, %21 : vector<16x32xf32>
    %23 = arith.mulf %22, %3 : vector<16x32xf32>
    %24 = arith.addf %23, %6 : vector<16x32xf32>
    %c0_9 = arith.constant 0 : index
    %c0_10 = arith.constant 0 : index
    %25 = vector.load %arg3[%c0_9, %c0_10] : memref<32x96xf32, #tpu.memory_space<vmem>>, vector<32x96xf32>
    %cst_11 = arith.constant dense<0.000000e+00> : vector<16x96xf32>
    %26 = tpu.matmul %24, %25, %cst_11 {dimension_numbers = #tpu.dot_dimension_numbers<[1], [0], [0], [1], [0, 0, 1, 1], [], []>} : vector<16x32xf32>, vector<32x96xf32>, vector<16x96xf32> -> vector<16x96xf32>
    %c0_12 = arith.constant 0 : index
    %c0_13 = arith.constant 0 : index
    %27 = vector.load %arg4[%c0_12, %c0_13] : memref<32x32xf32, #tpu.memory_space<vmem>>, vector<32x32xf32>
    %cst_14 = arith.constant 0.000000e+00 : f32
    %28 = vector.broadcast %cst_14 : f32 to vector<8x32xf32>
    %29 = vector.extract_strided_slice %26 {offsets = [0, 0], sizes = [8, 16], strides = [1, 1]} : vector<16x96xf32> to vector<8x16xf32>
    %30 = vector.extract_strided_slice %26 {offsets = [0, 32], sizes = [8, 16], strides = [1, 1]} : vector<16x96xf32> to vector<8x16xf32>
    %31 = vector.extract_strided_slice %26 {offsets = [0, 64], sizes = [8, 16], strides = [1, 1]} : vector<16x96xf32> to vector<8x16xf32>
    %cst_15 = arith.constant dense<0.000000e+00> : vector<8x8xf32>
    %32 = tpu.matmul %29, %30, %cst_15 {dimension_numbers = #tpu.dot_dimension_numbers<[1], [1], [0], [0], [0, 0, 1, 0], [], []>} : vector<8x16xf32>, vector<8x16xf32>, vector<8x8xf32> -> vector<8x8xf32>
    %cst_16 = arith.constant 2.500000e-01 : f32
    %33 = vector.broadcast %cst_16 : f32 to vector<8x8xf32>
    %34 = arith.mulf %32, %33 : vector<8x8xf32>
    %cst_17 = arith.constant dense<0xFF800000> : vector<8xf32>
    %35 = vector.multi_reduction <maximumf>, %34, %cst_17 [1] : vector<8x8xf32> to vector<8xf32>
    %36 = vector.shape_cast %35 : vector<8xf32> to vector<8x1xf32>
    %37 = vector.broadcast %36 : vector<8x1xf32> to vector<8x8xf32>
    %38 = arith.subf %34, %37 : vector<8x8xf32>
    %39 = math.exp %38 : vector<8x8xf32>
    %cst_18 = arith.constant dense<0.000000e+00> : vector<8xf32>
    %40 = vector.multi_reduction <add>, %39, %cst_18 [1] : vector<8x8xf32> to vector<8xf32>
    %41 = vector.shape_cast %40 : vector<8xf32> to vector<8x1xf32>
    %42 = tpu.reciprocal %41 {approx = true} : vector<8x1xf32> -> vector<8x1xf32>
    %43 = vector.broadcast %42 : vector<8x1xf32> to vector<8x8xf32>
    %44 = arith.mulf %39, %43 : vector<8x8xf32>
    %cst_19 = arith.constant dense<0.000000e+00> : vector<8x16xf32>
    %45 = tpu.matmul %44, %31, %cst_19 {dimension_numbers = #tpu.dot_dimension_numbers<[1], [0], [0], [1], [0, 0, 1, 1], [], []>} : vector<8x8xf32>, vector<8x16xf32>, vector<8x16xf32> -> vector<8x16xf32>
    %46 = vector.extract_strided_slice %27 {offsets = [0, 0], sizes = [16, 32], strides = [1, 1]} : vector<32x32xf32> to vector<16x32xf32>
    %cst_20 = arith.constant dense<0.000000e+00> : vector<8x32xf32>
    %47 = tpu.matmul %45, %46, %cst_20 {dimension_numbers = #tpu.dot_dimension_numbers<[1], [0], [0], [1], [0, 0, 1, 1], [], []>} : vector<8x16xf32>, vector<16x32xf32>, vector<8x32xf32> -> vector<8x32xf32>
    %48 = arith.addf %28, %47 : vector<8x32xf32>
    %49 = vector.extract_strided_slice %26 {offsets = [0, 16], sizes = [8, 16], strides = [1, 1]} : vector<16x96xf32> to vector<8x16xf32>
    %50 = vector.extract_strided_slice %26 {offsets = [0, 48], sizes = [8, 16], strides = [1, 1]} : vector<16x96xf32> to vector<8x16xf32>
    %51 = vector.extract_strided_slice %26 {offsets = [0, 80], sizes = [8, 16], strides = [1, 1]} : vector<16x96xf32> to vector<8x16xf32>
    %cst_21 = arith.constant dense<0.000000e+00> : vector<8x8xf32>
    %52 = tpu.matmul %49, %50, %cst_21 {dimension_numbers = #tpu.dot_dimension_numbers<[1], [1], [0], [0], [0, 0, 1, 0], [], []>} : vector<8x16xf32>, vector<8x16xf32>, vector<8x8xf32> -> vector<8x8xf32>
    %cst_22 = arith.constant 2.500000e-01 : f32
    %53 = vector.broadcast %cst_22 : f32 to vector<8x8xf32>
    %54 = arith.mulf %52, %53 : vector<8x8xf32>
    %cst_23 = arith.constant dense<0xFF800000> : vector<8xf32>
    %55 = vector.multi_reduction <maximumf>, %54, %cst_23 [1] : vector<8x8xf32> to vector<8xf32>
    %56 = vector.shape_cast %55 : vector<8xf32> to vector<8x1xf32>
    %57 = vector.broadcast %56 : vector<8x1xf32> to vector<8x8xf32>
    %58 = arith.subf %54, %57 : vector<8x8xf32>
    %59 = math.exp %58 : vector<8x8xf32>
    %cst_24 = arith.constant dense<0.000000e+00> : vector<8xf32>
    %60 = vector.multi_reduction <add>, %59, %cst_24 [1] : vector<8x8xf32> to vector<8xf32>
    %61 = vector.shape_cast %60 : vector<8xf32> to vector<8x1xf32>
    %62 = tpu.reciprocal %61 {approx = true} : vector<8x1xf32> -> vector<8x1xf32>
    %63 = vector.broadcast %62 : vector<8x1xf32> to vector<8x8xf32>
    %64 = arith.mulf %59, %63 : vector<8x8xf32>
    %cst_25 = arith.constant dense<0.000000e+00> : vector<8x16xf32>
    %65 = tpu.matmul %64, %51, %cst_25 {dimension_numbers = #tpu.dot_dimension_numbers<[1], [0], [0], [1], [0, 0, 1, 1], [], []>} : vector<8x8xf32>, vector<8x16xf32>, vector<8x16xf32> -> vector<8x16xf32>
    %66 = vector.extract_strided_slice %27 {offsets = [16, 0], sizes = [16, 32], strides = [1, 1]} : vector<32x32xf32> to vector<16x32xf32>
    %cst_26 = arith.constant dense<0.000000e+00> : vector<8x32xf32>
    %67 = tpu.matmul %65, %66, %cst_26 {dimension_numbers = #tpu.dot_dimension_numbers<[1], [0], [0], [1], [0, 0, 1, 1], [], []>} : vector<8x16xf32>, vector<16x32xf32>, vector<8x32xf32> -> vector<8x32xf32>
    %68 = arith.addf %48, %67 : vector<8x32xf32>
    %cst_27 = arith.constant 0.000000e+00 : f32
    %69 = vector.broadcast %cst_27 : f32 to vector<8x32xf32>
    %70 = vector.extract_strided_slice %26 {offsets = [8, 0], sizes = [8, 16], strides = [1, 1]} : vector<16x96xf32> to vector<8x16xf32>
    %71 = vector.extract_strided_slice %26 {offsets = [8, 32], sizes = [8, 16], strides = [1, 1]} : vector<16x96xf32> to vector<8x16xf32>
    %72 = vector.extract_strided_slice %26 {offsets = [8, 64], sizes = [8, 16], strides = [1, 1]} : vector<16x96xf32> to vector<8x16xf32>
    %cst_28 = arith.constant dense<0.000000e+00> : vector<8x8xf32>
    %73 = tpu.matmul %70, %71, %cst_28 {dimension_numbers = #tpu.dot_dimension_numbers<[1], [1], [0], [0], [0, 0, 1, 0], [], []>} : vector<8x16xf32>, vector<8x16xf32>, vector<8x8xf32> -> vector<8x8xf32>
    %cst_29 = arith.constant 2.500000e-01 : f32
    %74 = vector.broadcast %cst_29 : f32 to vector<8x8xf32>
    %75 = arith.mulf %73, %74 : vector<8x8xf32>
    %cst_30 = arith.constant dense<0xFF800000> : vector<8xf32>
    %76 = vector.multi_reduction <maximumf>, %75, %cst_30 [1] : vector<8x8xf32> to vector<8xf32>
    %77 = vector.shape_cast %76 : vector<8xf32> to vector<8x1xf32>
    %78 = vector.broadcast %77 : vector<8x1xf32> to vector<8x8xf32>
    %79 = arith.subf %75, %78 : vector<8x8xf32>
    %80 = math.exp %79 : vector<8x8xf32>
    %cst_31 = arith.constant dense<0.000000e+00> : vector<8xf32>
    %81 = vector.multi_reduction <add>, %80, %cst_31 [1] : vector<8x8xf32> to vector<8xf32>
    %82 = vector.shape_cast %81 : vector<8xf32> to vector<8x1xf32>
    %83 = tpu.reciprocal %82 {approx = true} : vector<8x1xf32> -> vector<8x1xf32>
    %84 = vector.broadcast %83 : vector<8x1xf32> to vector<8x8xf32>
    %85 = arith.mulf %80, %84 : vector<8x8xf32>
    %cst_32 = arith.constant dense<0.000000e+00> : vector<8x16xf32>
    %86 = tpu.matmul %85, %72, %cst_32 {dimension_numbers = #tpu.dot_dimension_numbers<[1], [0], [0], [1], [0, 0, 1, 1], [], []>} : vector<8x8xf32>, vector<8x16xf32>, vector<8x16xf32> -> vector<8x16xf32>
    %87 = vector.extract_strided_slice %27 {offsets = [0, 0], sizes = [16, 32], strides = [1, 1]} : vector<32x32xf32> to vector<16x32xf32>
    %cst_33 = arith.constant dense<0.000000e+00> : vector<8x32xf32>
    %88 = tpu.matmul %86, %87, %cst_33 {dimension_numbers = #tpu.dot_dimension_numbers<[1], [0], [0], [1], [0, 0, 1, 1], [], []>} : vector<8x16xf32>, vector<16x32xf32>, vector<8x32xf32> -> vector<8x32xf32>
    %89 = arith.addf %69, %88 : vector<8x32xf32>
    %90 = vector.extract_strided_slice %26 {offsets = [8, 16], sizes = [8, 16], strides = [1, 1]} : vector<16x96xf32> to vector<8x16xf32>
    %91 = vector.extract_strided_slice %26 {offsets = [8, 48], sizes = [8, 16], strides = [1, 1]} : vector<16x96xf32> to vector<8x16xf32>
    %92 = vector.extract_strided_slice %26 {offsets = [8, 80], sizes = [8, 16], strides = [1, 1]} : vector<16x96xf32> to vector<8x16xf32>
    %cst_34 = arith.constant dense<0.000000e+00> : vector<8x8xf32>
    %93 = tpu.matmul %90, %91, %cst_34 {dimension_numbers = #tpu.dot_dimension_numbers<[1], [1], [0], [0], [0, 0, 1, 0], [], []>} : vector<8x16xf32>, vector<8x16xf32>, vector<8x8xf32> -> vector<8x8xf32>
    %cst_35 = arith.constant 2.500000e-01 : f32
    %94 = vector.broadcast %cst_35 : f32 to vector<8x8xf32>
    %95 = arith.mulf %93, %94 : vector<8x8xf32>
    %cst_36 = arith.constant dense<0xFF800000> : vector<8xf32>
    %96 = vector.multi_reduction <maximumf>, %95, %cst_36 [1] : vector<8x8xf32> to vector<8xf32>
    %97 = vector.shape_cast %96 : vector<8xf32> to vector<8x1xf32>
    %98 = vector.broadcast %97 : vector<8x1xf32> to vector<8x8xf32>
    %99 = arith.subf %95, %98 : vector<8x8xf32>
    %100 = math.exp %99 : vector<8x8xf32>
    %cst_37 = arith.constant dense<0.000000e+00> : vector<8xf32>
    %101 = vector.multi_reduction <add>, %100, %cst_37 [1] : vector<8x8xf32> to vector<8xf32>
    %102 = vector.shape_cast %101 : vector<8xf32> to vector<8x1xf32>
    %103 = tpu.reciprocal %102 {approx = true} : vector<8x1xf32> -> vector<8x1xf32>
    %104 = vector.broadcast %103 : vector<8x1xf32> to vector<8x8xf32>
    %105 = arith.mulf %100, %104 : vector<8x8xf32>
    %cst_38 = arith.constant dense<0.000000e+00> : vector<8x16xf32>
    %106 = tpu.matmul %105, %92, %cst_38 {dimension_numbers = #tpu.dot_dimension_numbers<[1], [0], [0], [1], [0, 0, 1, 1], [], []>} : vector<8x8xf32>, vector<8x16xf32>, vector<8x16xf32> -> vector<8x16xf32>
    %107 = vector.extract_strided_slice %27 {offsets = [16, 0], sizes = [16, 32], strides = [1, 1]} : vector<32x32xf32> to vector<16x32xf32>
    %cst_39 = arith.constant dense<0.000000e+00> : vector<8x32xf32>
    %108 = tpu.matmul %106, %107, %cst_39 {dimension_numbers = #tpu.dot_dimension_numbers<[1], [0], [0], [1], [0, 0, 1, 1], [], []>} : vector<8x16xf32>, vector<16x32xf32>, vector<8x32xf32> -> vector<8x32xf32>
    %109 = arith.addf %89, %108 : vector<8x32xf32>
    %110 = tpu.concatenate %68, %109 in 0 : vector<8x32xf32>, vector<8x32xf32> -> vector<16x32xf32>
    %111 = arith.addf %0, %110 : vector<16x32xf32>
    %cst_40 = arith.constant dense<0.000000e+00> : vector<16xf32>
    %112 = vector.multi_reduction <add>, %111, %cst_40 [1] : vector<16x32xf32> to vector<16xf32>
    %113 = vector.shape_cast %112 : vector<16xf32> to vector<16x1xf32>
    %cst_41 = arith.constant 3.200000e+01 : f32
    %114 = vector.broadcast %cst_41 : f32 to vector<16x1xf32>
    %115 = arith.divf %113, %114 : vector<16x1xf32>
    %116 = vector.broadcast %115 : vector<16x1xf32> to vector<16x32xf32>
    %117 = arith.subf %111, %116 : vector<16x32xf32>
    %118 = arith.mulf %117, %117 : vector<16x32xf32>
    %cst_42 = arith.constant dense<0.000000e+00> : vector<16xf32>
    %119 = vector.multi_reduction <add>, %118, %cst_42 [1] : vector<16x32xf32> to vector<16xf32>
    %120 = vector.shape_cast %119 : vector<16xf32> to vector<16x1xf32>
    %cst_43 = arith.constant 3.200000e+01 : f32
    %121 = vector.broadcast %cst_43 : f32 to vector<16x1xf32>
    %122 = arith.divf %120, %121 : vector<16x1xf32>
    %cst_44 = arith.constant 9.99999974E-6 : f32
    %123 = vector.broadcast %cst_44 : f32 to vector<16x1xf32>
    %124 = arith.addf %122, %123 : vector<16x1xf32>
    %125 = math.rsqrt %124 : vector<16x1xf32>
    %126 = vector.broadcast %125 : vector<16x1xf32> to vector<16x32xf32>
    %127 = arith.mulf %117, %126 : vector<16x32xf32>
    %128 = arith.mulf %127, %3 : vector<16x32xf32>
    %129 = arith.addf %128, %6 : vector<16x32xf32>
    %c0_45 = arith.constant 0 : index
    %c0_46 = arith.constant 0 : index
    %130 = vector.load %arg5[%c0_45, %c0_46] : memref<16x32xf32, #tpu.memory_space<vmem>>, vector<16x32xf32>
    tpu.vector_store %arg5[%c0_45, %c0_46], %129 {strides = array<i32>} : memref<16x32xf32, #tpu.memory_space<vmem>>, vector<16x32xf32>,
    return
  }
}

</mosaic_0001>

<bundles_post_ra>
// kernel: tpu_custom_call.1
= control target key start
LH: loop header
LB: loop body
LE: loop exit
PB: predicated region body
PF: predicated region fallthrough
CT: control target
= control target key end

     0   :  { %10 = vsyncpa [#allocation3], 0  ;;  %s1721_s0 = inlined_call_operand.hbm [shape: f32[16,32], index: 0, kind: input, shape index: {}]   ;;  %s1722_s1 = inlined_call_operand.vmem [shape: f32[1,32], index: 1, kind: input, shape index: {}]   ;;  %s1723_s2 = inlined_call_operand.vmem [shape: f32[1,32], index: 2, kind: input, shape index: {}]   ;;  %s1724_s3 = inlined_call_operand.hbm [shape: f32[32,96], index: 3, kind: input, shape index: {}]   ;;  %s1725_s4 = inlined_call_operand.hbm [shape: f32[32,32], index: 4, kind: input, shape index: {}]   ;;  %s1726_s5 = inlined_call_operand.hbm [shape: f32[16,32], index: 5, kind: output, shape index: {}]  }
   0x1   :  { %11 = vsyncpa [#allocation6], 0 }
   0x2   :  { %12 = vsyncpa [#allocation4], 0  ;;  %s1492_s18 = smov [#allocation5]   ;;  %s1493_s20 = smov [#allocation2]  }
   0x3   :  { %s34_s19 = sshll.u32 %s1492_s18, 4  ;;  %s18_s21 = sshll.u32 %s1493_s20, 4  ;;  %s35_s19 = int_to_ptr.vmem [resolvable:$true] %s34_s19  ;;  %s1536_s21 = int_to_ptr.vmem [resolvable:$true] %s18_s21 }
   0x4   :  { %s1398_s24 = scalar_lea.hbm %s1724_s3, 512 }
   0x5   :  { %p1399_p0 = scmp.ne.s32.totalorder %s1724_s3, %s1398_s24  ;;  %p1402_p1 = scmp.lt.u32.totalorder %s1398_s24, %s1724_s3 }
   0x7   :  { %p1404_p2 = pnand %p1402_p1, %p1399_p0 }
   0x9   :  { %1407 = shalt.err (!%p1404_p2)
}
   0xa   :  { %s1408_s29 = scalar_lea.vmem %s35_s19, 512  ;;  %p1413_p4 = scmp.lt.s32.totalorder %s35_s19, %s35_s19 }
   0xb   :  { %p1409_p3 = scmp.ne.s32.totalorder %s35_s19, %s1408_s29  ;;  %p1414_p5 = scmp.lt.s32.totalorder %s1408_s29, %s1408_s29 }
   0xd   :  { %p1415_p6 = por %p1414_p5, %p1413_p4 }
   0xf   :  { %p1416_p7 = pnand %p1415_p6, %p1409_p3 }
  0x11   :  { %1419 = shalt.err (!%p1416_p7)
}
  0x12   :  { %s1494_s30 = smov 128   ;;  %s1495_s6 = smov 8  }
  0x13   :  { %40 = dma.hbm_to_vmem [thread:$0]  %s1724_s3, 512, %s35_s19, [#allocation6], %s1494_s30, %s1494_s30, %s1495_s6  }
  0x14   :  { %s1420_s11 = scalar_lea.hbm %s1721_s0, 256 }
  0x15   :  { %p1421_p8 = scmp.ne.s32.totalorder %s1721_s0, %s1420_s11  ;;  %p1424_p9 = scmp.lt.u32.totalorder %s1420_s11, %s1721_s0 }
  0x17   :  { %p1426_p10 = pnand %p1424_p9, %p1421_p8 }
  0x19   :  { %1429 = shalt.err (!%p1426_p10)
}
  0x1a   :  { %s1430_s16 = scalar_lea.vmem %s1536_s21, 256  ;;  %p1435_p12 = scmp.lt.s32.totalorder %s1536_s21, %s1536_s21 }
  0x1b   :  { %p1431_p11 = scmp.ne.s32.totalorder %s1536_s21, %s1430_s16  ;;  %p1436_p13 = scmp.lt.s32.totalorder %s1430_s16, %s1430_s16 }
  0x1d   :  { %p1437_p0 = por %p1436_p13, %p1435_p12 }
  0x1f   :  { %p1438_p1 = pnand %p1437_p0, %p1431_p11 }
  0x21   :  { %1441 = shalt.err (!%p1438_p1)
}
  0x22   :  { %24 = dma.hbm_to_vmem [thread:$0]  %s1721_s0, 256, %s1536_s21, [#allocation3], %s1494_s30, %s1494_s30, %s1495_s6  }
  0x23   :  { %s1496_s18 = smov [#allocation7]   ;;  %s1442_s23 = scalar_lea.hbm %s1725_s4, 512 }
  0x24   :  { %s46_s19 = sshll.u32 %s1496_s18, 4  ;;  %p1443_p2 = scmp.ne.s32.totalorder %s1725_s4, %s1442_s23  ;;  %s47_s19 = int_to_ptr.vmem [resolvable:$true] %s46_s19 }
  0x25   :  { %p1446_p3 = scmp.lt.u32.totalorder %s1442_s23, %s1725_s4 }
  0x27   :  { %p1448_p4 = pnand %p1446_p3, %p1443_p2 }
  0x29   :  { %1451 = shalt.err (!%p1448_p4)
}
  0x2a   :  { %s1452_s28 = scalar_lea.vmem %s47_s19, 512  ;;  %p1457_p6 = scmp.lt.s32.totalorder %s47_s19, %s47_s19 }
  0x2b   :  { %p1453_p5 = scmp.ne.s32.totalorder %s47_s19, %s1452_s28  ;;  %p1458_p7 = scmp.lt.s32.totalorder %s1452_s28, %s1452_s28 }
  0x2d   :  { %p1459_p8 = por %p1458_p7, %p1457_p6 }
  0x2f   :  { %p1460_p9 = pnand %p1459_p8, %p1453_p5 }
  0x31   :  { %1463 = shalt.err (!%p1460_p9)
}
  0x32   :  { %52 = dma.hbm_to_vmem [thread:$0]  %s1725_s4, 512, %s47_s19, [#allocation6], %s1494_s30, %s1494_s30, %s1495_s6  }
  0x33   :  { %1486 = dma.done.wait [#allocation3], 256  }
  0x34   :  { %1487 = vsyncadd [#allocation3], 4294967040 }
  0x35   :  { %1488 = dma.done.wait [#allocation6], 1024  }
  0x36   :  { %1489 = vsyncadd [#allocation6], 4294966272  ;;  %vm78_vm0 = vcmask 261120   ;;  %v1588_v0 = vld [vmem:[#allocation2] sm:$0xff]  ;;  %v1590_v1 = vld [vmem:[#allocation2 + $0x8] sm:$0xff]  ;;  %v1497_v36 = vmov 0.0  }
  0x37   :  { %v79_v2 = vsel %vm78_vm0, %v1588_v0, 0.0  ;;  %v82_v3 = vsel %vm78_vm0, %v1590_v1, 0.0  ;;  %v110_v14 = vld [vmem:[#allocation5] sm:$0xff]  ;;  %v111_v15 = vld [vmem:[#allocation5 + $0x8] sm:$0xff]  ;;  %v112_v16 = vld [vmem:[#allocation5 + $0x10] sm:$0xff]  ;;  %1272 = vmatprep.subr.mxu1 %v1497_v36  ;;  %vm1498_vm1 = vmmov 0  }
  0x38   :  { %80 = vadd.xlane.f32.xlu0 %v79_v2  ;;  %v1340_v17 = vpack.c.bf16 %v111_v15, %v110_v14  ;;  %v113_v18 = vld [vmem:[#allocation5 + $0x18] sm:$0xff]  ;;  %v1603_v27 = vld [vmem:[%s1722_s1] ss:$0 sm:$0xff]  ;;  %1274 = vmatprep.mubr.msk.f32.mxu1 %vm1498_vm1, %v1497_v36  ;;  %s1499_s1 = smov 80   ;;  %s1501_s9 = smov 112   ;;  %vm202_vm2 = vcmask 130048  }
  0x39   :  { %v1344_v19 = vpack.c.bf16 %v113_v18, %v112_v16  ;;  %v1608_v29 = vld [vmem:[%s1723_s2] ss:$0 sm:$0xff]  ;;  %s1500_s2 = smov 96   ;;  %vm278_vm3 = vcmask 64512   ;;  %s1502_s10 = smov 64   ;;  %v198_v62 = vld [vmem:[#allocation7 + $0x18] sm:$0xff] }
  0x3a   :  { %1341 = vmatprep.subr.bf16.mxu0 %v1340_v17  ;;  %s1503_s11 = smov 48   ;;  %v197_v61 = vld [vmem:[#allocation7 + $0x10] sm:$0xff]  ;;  %v1504_v63 = vmov 0.0|0.0   ;;  %s1505_s12 = smov [#allocation8]  }
  0x3b   :  { %1343 = vmatpush3.bf16.msra.mxu0 %v1340_v17  ;;  %v1349_v2 = vpack.c.bf16 %v198_v62, %v197_v61  ;;  %s1194_s13 = sshll.u32 %s1505_s12, 4  ;;  %s1195_s13 = int_to_ptr.vmem [resolvable:$true] %s1194_s13 }
  0x3c   :  { %83 = vadd.xlane.f32.xlu0 %v82_v3  ;;  %1345 = vmatprep.subr.bf16.mxu0 %v1344_v19  ;;  %s1464_s14 = scalar_lea.vmem %s1195_s13, 256  ;;  %p1469_p11 = scmp.lt.s32.totalorder %s1195_s13, %s1195_s13 }
  0x3d   :  { %p1465_p10 = scmp.ne.s32.totalorder %s1195_s13, %s1464_s14  ;;  %p1470_p12 = scmp.lt.s32.totalorder %s1464_s14, %s1464_s14 }
  0x3f   :  { %1347 = vmatpush3.bf16.msra.mxu0 %v1344_v19  ;;  %p1471_p13 = por %p1470_p12, %p1469_p11 }
  0x40   :  { %1282 = vmatprep.subr.mxu0 %v1497_v36 }
  0x41   :  { %p1472_p0 = pnand %p1471_p13, %p1465_p10 }
  0xc5   :  { %v81_v4 = vpop.xlane.xlu0 %80 }
  0xc6   :  { %v86_v5 = vmul.f32 0.03125, %v81_v4 }
  0xc8   :  { %v88_v6 = vsub.f32 %v1588_v0, %v86_v5 }
  0xc9   :  { %v84_v7 = vpop.xlane.xlu0 %83 }
  0xca   :  { %v87_v8 = vmul.f32 0.03125, %v84_v7  ;;  %v90_v9 = vmul.f32 %v88_v6, %v88_v6  ;;  %v195_v7 = vld [vmem:[#allocation7] sm:$0xff] }
  0xcc   :  { %v89_v10 = vsub.f32 %v1590_v1, %v87_v8  ;;  %v92_v11 = vsel %vm78_vm0, %v90_v9, 0.0  ;;  %v196_v8 = vld [vmem:[#allocation7 + $0x8] sm:$0xff] }
  0xcd   :  { %93 = vadd.xlane.f32.xlu1 %v92_v11  ;;  %v1650_v11 = vpack.c.bf16 %v196_v8, %v195_v7 }
  0xce   :  { %v91_v12 = vmul.f32 %v89_v10, %v89_v10 }
  0xd0   :  { %v95_v13 = vsel %vm78_vm0, %v91_v12, 0.0 }
  0xd1   :  { %96 = vadd.xlane.f32.xlu1 %v95_v13 }
 0x15a   :  { %v94_v20 = vpop.xlane.xlu1 %93 }
 0x15b   :  { %v98_v21 = vmul.f32 0.03125, %v94_v20 }
 0x15d   :  { %v100_v22 = vadd.f32 1e-05, %v98_v21 }
 0x15e   :  { %v97_v23 = vpop.xlane.xlu1 %96 }
 0x15f   :  { %1374 = vrsqrt.f32 %v100_v22  ;;  %v99_v24 = vmul.f32 0.03125, %v97_v23 }
 0x161   :  { %v101_v25 = vadd.f32 1e-05, %v99_v24 }
 0x163   :  { %1376 = vrsqrt.f32 %v101_v25 }
 0x169   :  { %v1375_v26 = vpop.eup %1374 }
 0x16a   :  { %v104_v28 = vmul.f32 %v1375_v26, %v88_v6 }
 0x16c   :  { %v106_v30 = vmul.f32 %v1603_v27, %v104_v28 }
 0x16d   :  { %v1377_v31 = vpop.eup %1376 }
 0x16e   :  { %v108_v32 = vadd.f32 %v1608_v29, %v106_v30  ;;  %v105_v33 = vmul.f32 %v1377_v31, %v89_v10 }
 0x170   :  { %1269 = vmatprep.mubr.msk.f32.mxu0 %vm78_vm0, %v108_v32  ;;  %v107_v34 = vmul.f32 %v1603_v27, %v105_v33 }
 0x172   :  { %v109_v35 = vadd.f32 %v1608_v29, %v107_v34 }
 0x174   :  { %1270 = vmatmul.mubr.msk.f32.vlgmr.msra.gmra.mrb[0].mxu0 %vm78_vm0, %v109_v35 }
 0x175   :  { %1284 = vmatprep.mubr.msk.f32.mxu0 %vm1498_vm1, %v1497_v36 }
 0x247   :  { %v1622_v37 = vpop.f32.mrb[0].mxu0 }
 0x248   :  { %v186_v38 = vpop.f32.mrb[1].mxu0 }
 0x249   :  { %368 = vrot.lane.b32.xlu1 %v186_v38, %s1499_s1  ;;  %200 = vrot.lane.b32.xlu0 %v186_v38, %s1500_s2 }
 0x24d   :  { %366 = vrot.lane.b32.xlu1 %v186_v38, %s1501_s9 }
 0x2bb   :  { %v369_v39 = vpop.permute.xlu1 %368  ;;  %v201_v40 = vpop.permute.xlu0 %200 }
 0x2bc   :  { %1273 = vmatpush3.xpose.msk.msra.mxu1 %vm202_vm2, %v201_v40  ;;  %1283 = vmatpush3.xpose.msk.msra.mxu0 %vm202_vm2, %v369_v39 }
 0x2bd   :  { %1277 = vmatprep.subr.mxu1 %v1497_v36  ;;  %1348 = vmatprep.subr.bf16.mxu0 %v1504_v63 }
 0x2bf   :  { %v367_v41 = vpop.permute.xlu1 %366  ;;  %1275 = vmatmul.mubr.msk.f32.vlgmr.msra.gmra.mrb[0].mxu1 %vm202_vm2, %v186_v38 }
 0x2c0   :  { %1285 = vmatmul.mubr.msk.f32.vlgmr.msra.gmra.mrb[2].mxu0 %vm202_vm2, %v367_v41  ;;  %1279 = vmatprep.mubr.msk.f32.mxu1 %vm1498_vm1, %v1497_v36 }
 0x2c1   :  { %1296 = vmatprep.mubr.msk.f32.mxu0 %vm1498_vm1, %v1497_v36  ;;  %1350 = vmatpush3.bf16.msra.mxu0 %v1349_v2 }
 0x2c2   :  { %1306 = vmatprep.subr.mxu0 %v1497_v36 }
 0x392   :  { %v273_v42 = vpop.f32.mrb[0].mxu1 }
 0x393   :  { %v277_v43 = vmul.f32 0.25, %v273_v42  ;;  %v1276_v44 = vpop.f32.mrb[1].mxu1  ;;  %v440_v45 = vpop.f32.mrb[2].mxu0 }
 0x394   :  { %v444_v46 = vmul.f32 0.25, %v440_v45  ;;  %v1286_v47 = vpop.f32.mrb[3].mxu0 }
 0x395   :  { %v279_v48 = vsel %vm278_vm3, %v277_v43, -inf }
 0x396   :  { %280 = vmax.xlane.f32.xlu1 %v279_v48  ;;  %v445_v49 = vsel %vm278_vm3, %v444_v46, -inf }
 0x397   :  { %446 = vmax.xlane.f32.xlu0 %v445_v49 }
 0x3a7   :  { %290 = vrot.lane.b32.xlu1 %v186_v38, %s1502_s10 }
 0x3ab   :  { %679 = vrot.lane.b32.xlu1 %v1622_v37, %s1500_s2 }
 0x3af   :  { %845 = vrot.lane.b32.xlu1 %v1622_v37, %s1499_s1 }
 0x3b3   :  { %843 = vrot.lane.b32.xlu1 %v1622_v37, %s1501_s9 }
 0x423   :  { %v281_v50 = vpop.xlane.xlu1 %280 }
 0x424   :  { %v282_v51 = vsub.f32 %v277_v43, %v281_v50  ;;  %v447_v52 = vpop.xlane.xlu0 %446 }
 0x425   :  { %v448_v53 = vsub.f32 %v444_v46, %v447_v52 }
 0x426   :  { %v283_v54 = vmul.f32 1.442695, %v282_v51 }
 0x427   :  { %v449_v55 = vmul.f32 1.442695, %v448_v53  ;;  %v291_v56 = vpop.permute.xlu1 %290 }
 0x428   :  { %1378 = vpow2.f32 %v283_v54  ;;  %1278 = vmatpush3.msra.mxu1 %v291_v56 }
 0x429   :  { %1287 = vmatprep.subr.mxu1 %v1497_v36  ;;  %1380 = vpow2.f32 %v449_v55 }
 0x42b   :  { %v680_v13 = vpop.permute.xlu1 %679 }
 0x42f   :  { %v846_v18 = vpop.permute.xlu1 %845 }
 0x432   :  { %v1379_v57 = vpop.eup %1378 }
 0x433   :  { %v285_v58 = vsel %vm278_vm3, %v1379_v57, 0.0  ;;  %v1381_v59 = vpop.eup %1380  ;;  %v844_v19 = vpop.permute.xlu1 %843 }
 0x434   :  { %286 = vadd.xlane.f32.xlu0 %v285_v58  ;;  %v451_v60 = vsel %vm278_vm3, %v1381_v59, 0.0 }
 0x438   :  { %452 = vadd.xlane.f32.xlu0 %v451_v60 }
 0x44e   :  { %456 = vrot.lane.b32.xlu0 %v186_v38, %s1503_s11 }
 0x4c1   :  { %v287_v3 = vpop.xlane.xlu0 %286 }
 0x4c2   :  { %1382 = vrcp.f32 %v287_v3 }
 0x4c5   :  { %v453_v4 = vpop.xlane.xlu0 %452 }
 0x4c6   :  { %1384 = vrcp.f32 %v453_v4 }
 0x4c9   :  { %v457_v9 = vpop.permute.xlu0 %456 }
 0x4cc   :  { %v1383_v5 = vpop.eup %1382 }
 0x4cd   :  { %v289_v6 = vmul.f32 %v1383_v5, %v1379_v57 }
 0x4cf   :  { %1280 = vmatmul.mubr.msk.f32.vlgmr.msra.gmra.mrb[2].mxu1 %vm278_vm3, %v289_v6 }
 0x4d0   :  { %v1385_v10 = vpop.eup %1384  ;;  %1288 = vmatpush3.msra.mxu1 %v457_v9  ;;  %1289 = vmatprep.mubr.msk.f32.mxu1 %vm1498_vm1, %v1497_v36 }
 0x4d1   :  { %v455_v12 = vmul.f32 %v1385_v10, %v1381_v59  ;;  %1351 = vmatprep.subr.bf16.mxu1 %v1504_v63 }
 0x4d3   :  { %1290 = vmatmul.mubr.msk.f32.vlgmr.msra.gmra.mrb[4].mxu1 %vm278_vm3, %v455_v12 }
 0x4d4   :  { %1353 = vmatpush3.bf16.msra.mxu1 %v1650_v11  ;;  %1303 = vmatprep.mubr.msk.f32.mxu1 %vm1498_vm1, %v1497_v36 }
 0x4d5   :  { %1311 = vmatprep.subr.mxu1 %v1497_v36 }
 0x5a2   :  { %v362_v14 = vpop.f32.mrb[2].mxu1 }
 0x5a3   :  { %v1281_v15 = vpop.f32.mrb[3].mxu1  ;;  %1304 = vmatmul.mubr.msk.f32.vlgmr.msra.gmra.mrb[6].mxu1 %vm202_vm2, %v362_v14 }
 0x5a4   :  { %1313 = vmatprep.mubr.msk.f32.mxu1 %vm1498_vm1, %v1497_v36 }
 0x5a6   :  { %v528_v16 = vpop.f32.mrb[4].mxu1 }
 0x5a7   :  { %v1291_v17 = vpop.f32.mrb[5].mxu1  ;;  %1297 = vmatmul.mubr.msk.f32.vlgmr.msra.gmra.mrb[4].mxu0 %vm202_vm2, %v528_v16 }
 0x5a8   :  { %1307 = vmatpush3.xpose.msk.msra.mxu0 %vm202_vm2, %v680_v13  ;;  %1308 = vmatprep.mubr.msk.f32.mxu0 %vm1498_vm1, %v1497_v36 }
 0x5a9   :  { %1316 = vmatprep.subr.mxu0 %v1497_v36 }
 0x5ab   :  { %1309 = vmatmul.mubr.msk.f32.vlgmr.msra.gmra.mrb[6].mxu0 %vm202_vm2, %v1622_v37 }
 0x5ac   :  { %1317 = vmatpush3.xpose.msk.msra.mxu0 %vm202_vm2, %v846_v18  ;;  %1318 = vmatprep.mubr.msk.f32.mxu0 %vm1498_vm1, %v1497_v36 }
 0x5ad   :  { %1354 = vmatprep.subr.bf16.mxu0 %v1504_v63 }
 0x5af   :  { %1319 = vmatmul.mubr.msk.f32.vlgmr.msra.gmra.mrb[8].mxu0 %vm202_vm2, %v844_v19 }
 0x5b0   :  { %1356 = vmatpush3.bf16.msra.mxu0 %v1349_v2  ;;  %1330 = vmatprep.mubr.msk.f32.mxu0 %vm1498_vm1, %v1497_v36 }
 0x676   :  { %v674_v20 = vpop.f32.mrb[6].mxu1 }
 0x677   :  { %v1305_v21 = vpop.f32.mrb[7].mxu1 }
 0x67a   :  { %v601_v22 = vpop.f32.mrb[4].mxu0 }
 0x67b   :  { %v675_v23 = vadd.f32 %v674_v20, %v601_v22  ;;  %v1298_v24 = vpop.f32.mrb[5].mxu0 }
 0x67d   :  { %v1155_v35 = vadd.f32 %v675_v23, %v1588_v0 }
 0x67e   :  { %v751_v25 = vpop.f32.mrb[6].mxu0 }
 0x67f   :  { %v755_v26 = vmul.f32 0.25, %v751_v25  ;;  %v1310_v28 = vpop.f32.mrb[7].mxu0  ;;  %v1157_v38 = vsel %vm78_vm0, %v1155_v35, 0.0 }
 0x681   :  { %v756_v30 = vsel %vm278_vm3, %v755_v26, -inf }
 0x682   :  { %757 = vmax.xlane.f32.xlu0 %v756_v30  ;;  %v917_v31 = vpop.f32.mrb[8].mxu0 }
 0x683   :  { %v921_v32 = vmul.f32 0.25, %v917_v31  ;;  %v1320_v33 = vpop.f32.mrb[9].mxu0 }
 0x685   :  { %v922_v34 = vsel %vm278_vm3, %v921_v32, -inf }
 0x686   :  { %923 = vmax.xlane.f32.xlu1 %v922_v34 }
 0x697   :  { %933 = vrot.lane.b32.xlu1 %v1622_v37, %s1503_s11 }
 0x6bb   :  { %1158 = vadd.xlane.f32.xlu1 %v1157_v38 }
 0x70f   :  { %v758_v39 = vpop.xlane.xlu0 %757 }
 0x710   :  { %v759_v40 = vsub.f32 %v755_v26, %v758_v39 }
 0x712   :  { %v760_v41 = vmul.f32 1.442695, %v759_v40 }
 0x713   :  { %v924_v42 = vpop.xlane.xlu1 %923 }
 0x714   :  { %1386 = vpow2.f32 %v760_v41  ;;  %v925_v43 = vsub.f32 %v921_v32, %v924_v42 }
 0x716   :  { %v926_v44 = vmul.f32 1.442695, %v925_v43 }
 0x717   :  { %v934_v53 = vpop.permute.xlu1 %933 }
 0x718   :  { %1388 = vpow2.f32 %v926_v44 }
 0x71e   :  { %v1387_v45 = vpop.eup %1386 }
 0x71f   :  { %v762_v46 = vsel %vm278_vm3, %v1387_v45, 0.0 }
 0x720   :  { %763 = vadd.xlane.f32.xlu0 %v762_v46 }
 0x722   :  { %v1389_v47 = vpop.eup %1388 }
 0x723   :  { %v928_v48 = vsel %vm278_vm3, %v1389_v47, 0.0 }
 0x724   :  { %929 = vadd.xlane.f32.xlu0 %v928_v48 }
 0x73a   :  { %767 = vrot.lane.b32.xlu0 %v1622_v37, %s1502_s10 }
 0x748   :  { %v1159_v59 = vpop.xlane.xlu1 %1158 }
 0x749   :  { %v1163_v61 = vmul.f32 0.03125, %v1159_v59 }
 0x74b   :  { %v1165_v2 = vsub.f32 %v1155_v35, %v1163_v61 }
 0x74d   :  { %v1167_v6 = vmul.f32 %v1165_v2, %v1165_v2 }
 0x74f   :  { %v1169_v7 = vsel %vm78_vm0, %v1167_v6, 0.0 }
 0x7ad   :  { %v764_v0 = vpop.xlane.xlu0 %763 }
 0x7ae   :  { %1390 = vrcp.f32 %v764_v0 }
 0x7b1   :  { %v930_v49 = vpop.xlane.xlu0 %929 }
 0x7b2   :  { %1392 = vrcp.f32 %v930_v49 }
 0x7b5   :  { %v768_v50 = vpop.permute.xlu0 %767 }
 0x7b6   :  { %1312 = vmatpush3.msra.mxu1 %v768_v50 }
 0x7b7   :  { %1321 = vmatprep.subr.mxu1 %v1497_v36 }
 0x7b8   :  { %v1391_v51 = vpop.eup %1390 }
 0x7b9   :  { %v766_v52 = vmul.f32 %v1391_v51, %v1387_v45 }
 0x7bb   :  { %1314 = vmatmul.mubr.msk.f32.vlgmr.msra.gmra.mrb[8].mxu1 %vm278_vm3, %v766_v52 }
 0x7bc   :  { %v1393_v54 = vpop.eup %1392  ;;  %1322 = vmatpush3.msra.mxu1 %v934_v53  ;;  %1323 = vmatprep.mubr.msk.f32.mxu1 %vm1498_vm1, %v1497_v36 }
 0x7bd   :  { %v932_v55 = vmul.f32 %v1393_v54, %v1389_v47  ;;  %1357 = vmatprep.subr.bf16.mxu1 %v1504_v63 }
 0x7bf   :  { %1324 = vmatmul.mubr.msk.f32.vlgmr.msra.gmra.mrb[10].mxu1 %vm278_vm3, %v932_v55 }
 0x7c0   :  { %1359 = vmatpush3.bf16.msra.mxu1 %v1650_v11  ;;  %1337 = vmatprep.mubr.msk.f32.mxu1 %vm1498_vm1, %v1497_v36 }
 0x88e   :  { %v839_v37 = vpop.f32.mrb[8].mxu1 }
 0x88f   :  { %v1315_v56 = vpop.f32.mrb[9].mxu1  ;;  %1338 = vmatmul.mubr.msk.f32.vlgmr.msra.gmra.mrb[12].mxu1 %vm202_vm2, %v839_v37 }
 0x892   :  { %v1005_v57 = vpop.f32.mrb[10].mxu1 }
 0x893   :  { %v1325_v58 = vpop.f32.mrb[11].mxu1  ;;  %1331 = vmatmul.mubr.msk.f32.vlgmr.msra.gmra.mrb[10].mxu0 %vm202_vm2, %v1005_v57 }
 0x962   :  { %v1151_v60 = vpop.f32.mrb[12].mxu1 }
 0x963   :  { %v1339_v62 = vpop.f32.mrb[13].mxu1 }
 0x966   :  { %v1078_v63 = vpop.f32.mrb[10].mxu0 }
 0x967   :  { %v1152_v3 = vadd.f32 %v1151_v60, %v1078_v63  ;;  %v1332_v4 = vpop.f32.mrb[11].mxu0 }
 0x969   :  { %v1156_v5 = vadd.f32 %v1152_v3, %v1590_v1 }
 0x96b   :  { %v1160_v36 = vsel %vm78_vm0, %v1156_v5, 0.0 }
 0x96c   :  { %1161 = vadd.xlane.f32.xlu0 %v1160_v36 }
 0x970   :  { %1170 = vadd.xlane.f32.xlu0 %v1169_v7 }
 0x9f9   :  { %v1162_v8 = vpop.xlane.xlu0 %1161 }
 0x9fa   :  { %v1164_v9 = vmul.f32 0.03125, %v1162_v8 }
 0x9fc   :  { %v1166_v10 = vsub.f32 %v1156_v5, %v1164_v9 }
 0x9fd   :  { %v1171_v11 = vpop.xlane.xlu0 %1170 }
 0x9fe   :  { %v1175_v12 = vmul.f32 0.03125, %v1171_v11  ;;  %v1168_v13 = vmul.f32 %v1166_v10, %v1166_v10 }
 0xa00   :  { %v1177_v14 = vadd.f32 1e-05, %v1175_v12  ;;  %v1172_v15 = vsel %vm78_vm0, %v1168_v13, 0.0 }
 0xa01   :  { %1173 = vadd.xlane.f32.xlu1 %v1172_v15 }
 0xa02   :  { %1394 = vrsqrt.f32 %v1177_v14 }
 0xa0c   :  { %v1395_v16 = vpop.eup %1394 }
 0xa0d   :  { %v1181_v1 = vmul.f32 %v1395_v16, %v1165_v2 }
 0xa0f   :  { %v1183_v17 = vmul.f32 %v1603_v27, %v1181_v1 }
 0xa11   :  { %v1185_v18 = vadd.f32 %v1608_v29, %v1183_v17 }
 0xa13   :  { %1187 = vst.msk [vmem:[#allocation8] sm:$0xff] %vm78_vm0, %v1185_v18 }
 0xa8e   :  { %v1174_v19 = vpop.xlane.xlu1 %1173 }
 0xa8f   :  { %v1176_v20 = vmul.f32 0.03125, %v1174_v19 }
 0xa91   :  { %v1178_v21 = vadd.f32 1e-05, %v1176_v20 }
 0xa93   :  { %1396 = vrsqrt.f32 %v1178_v21 }
 0xa9d   :  { %v1397_v22 = vpop.eup %1396 }
 0xa9e   :  { %v1182_v23 = vmul.f32 %v1397_v22, %v1166_v10 }
 0xaa0   :  { %v1184_v24 = vmul.f32 %v1603_v27, %v1182_v23 }
 0xaa2   :  { %v1186_v25 = vadd.f32 %v1608_v29, %v1184_v24 }
 0xaa4   :  { %1188 = vst.msk [vmem:[#allocation8 + $0x8] sm:$0xff] %vm78_vm0, %v1186_v25 }
 0xaa5   :  { %1475 = shalt.err (!%p1472_p0)
}
 0xaa6   :  { %s1476_s3 = scalar_lea.hbm %s1726_s5, 256 }
 0xaa7   :  { %p1477_p1 = scmp.ne.s32.totalorder %s1726_s5, %s1476_s3  ;;  %p1480_p2 = scmp.lt.u32.totalorder %s1476_s3, %s1726_s5 }
 0xaa9   :  { %p1482_p3 = pnand %p1480_p2, %p1477_p1 }
 0xaab   :  { %1485 = shalt.err (!%p1482_p3)
}
 0xaac   :  { %1200 = dma.vmem_to_hbm [thread:$0]  %s1195_s13, 256, %s1726_s5, [#allocation4], %s1494_s30, %s1494_s30, %s1495_s6  }
 0xaad   :  { %1490 = dma.done.wait [#allocation4], 256  }
 0xaae   :  { %1491 = vsyncadd [#allocation4], 4294967040 }
 0xaaf   :  { %1204 = vsyncpa [#allocation3], 1 }
 0xab0   :  { %1205 = vsyncpa [#allocation6], 1 }
 0xab1   :  { %1206 = vsyncpa [#allocation4], 1 }

</bundles_post_ra>
